<compile_context>
chip_gen: v6e
topology: v6e:2x2x1
jax: 0.10.0
libtpu: 0.0.40
codegen_flags: <defaults>
</compile_context>

<pallas_src>
import jax
import jax.numpy as jnp
from jax.experimental import pallas as pl
from jax.experimental.pallas import tpu as pltpu

BN_EPS = 1e-5


def dense_block_kernel(x_ref, scale_ref, shift_ref, w_ref, b_ref, out_ref):
    """Fused (folded-BN) normalize -> silu -> Linear -> concat(Y, X).

    x_ref:     (TN, C_in)        input row tile
    scale_ref: (1, C_in)         gamma / sqrt(var + eps)   (precomputed)
    shift_ref: (1, C_in)         beta - mean * scale       (precomputed)
    w_ref:     (C_in, C_out)     Linear weight, already transposed
    b_ref:     (1, C_out)        Linear bias
    out_ref:   (TN, C_out+C_in)  concat(Y, X) output tile
    """
    c_out = w_ref.shape[1]

    x = x_ref[...]
    xf = x.astype(jnp.float32)

    # BatchNorm folded into one per-channel FMA (VPU), kept in f32.
    h = xf * scale_ref[...] + shift_ref[...]

    # act_function(x) = sigmoid(x) * x  (exp lands on the EUP slot).
    h = jax.nn.sigmoid(h) * h

    # Linear: h @ W^T + b. If W is bf16, feed the MXU native bf16 operands
    # (f32 accumulation); otherwise keep f32.
    if w_ref.dtype == jnp.bfloat16:
        h = h.astype(jnp.bfloat16)
    y = jnp.dot(h, w_ref[...], preferred_element_type=jnp.float32) + b_ref[...]

    # Fused torch.cat((Y, X), dim=1): two direct slab stores, no concat temp.
    out_ref[:, :c_out] = y.astype(out_ref.dtype)
    out_ref[:, c_out:] = x.astype(out_ref.dtype)


def _vmem_capacity_bytes():
    try:
        return int(pltpu.get_tpu_info().vmem_capacity_bytes)
    except Exception:
        return 64 * 1024 * 1024  # conservative (v7x per-TC VMEM)


def _pick_block_n(n, c_in, c_out, x_itemsize, out_itemsize, w_itemsize, base):
    """VMEM-budget-aware row-tile size (multiple of `base`, <= 1024)."""
    budget = _vmem_capacity_bytes() // 2  # leave half of VMEM as headroom

    # Resident operands (double-buffered by default): W, scale, shift, bias.
    resident = 2 * (c_in * c_out * w_itemsize + 4 * (2 * c_in + c_out))

    # Per-row cost: double-buffered x tile + out tile, plus f32 intermediates
    # (normalized/silu activations and the f32 matmul accumulator).
    per_row = (2 * (c_in * x_itemsize + (c_in + c_out) * out_itemsize)
               + 4 * (3 * c_in + 2 * c_out))

    max_rows = max(base, (budget - resident) // max(per_row, 1))
    block_n = max(base, min(1024, (max_rows // base) * base))

    # Don't make the tile larger than the (base-padded) batch.
    n_padded = pl.cdiv(n, base) * base
    return min(block_n, n_padded)


def dense_block_forward(x, gamma, beta, w_t, b):
    """DenseBlock forward.

    x:     (N, C_in)
    gamma: (C_in,)        BatchNorm weight
    beta:  (C_in,)        BatchNorm bias
    w_t:   (C_in, C_out)  Linear weight, pre-transposed once at init time
    b:     (C_out,)       Linear bias
    returns (N, C_out + C_in) == torch.cat((Y, X), dim=1)
    """
    n, c_in = x.shape
    c_out = w_t.shape[1]

    # --- Pass 1 (tiny, single read of X): full-batch BN stats in f32, folded
    # into one per-channel scale/shift. Kept outside the tiled kernel so
    # tiling over N stays exact w.r.t. batch statistics.
    # TODO(synk): eval-mode BatchNorm (running stats) would only change how
    # scale/shift are computed here; the kernel itself is unchanged.
    xf = x.astype(jnp.float32)
    mean = jnp.mean(xf, axis=0, keepdims=True)                     # (1, C_in)
    mean_sq = jnp.mean(jnp.square(xf), axis=0, keepdims=True)      # (1, C_in)
    var = jnp.maximum(mean_sq - jnp.square(mean), 0.0)             # biased var
    scale = gamma.reshape(1, c_in).astype(jnp.float32) * jax.lax.rsqrt(var + BN_EPS)
    shift = beta.reshape(1, c_in).astype(jnp.float32) - mean * scale
    b2 = b.reshape(1, c_out).astype(jnp.float32)

    # --- Pass 2: N-tiled normalize -> silu -> matmul -> concat kernel. ---
    base = 16 if x.dtype == jnp.bfloat16 else 8  # bf16 sublane packing
    block_n = _pick_block_n(n, c_in, c_out,
                            x.dtype.itemsize, x.dtype.itemsize,
                            w_t.dtype.itemsize, base)
    grid = (pl.cdiv(n, block_n),)  # partial last block is masked by Pallas

    # Explicit scoped-VMEM limit sized from the actual buffers (with headroom),
    # capped below physical VMEM of the current chip generation.
    tile_bytes = (2 * block_n * (c_in + (c_in + c_out)) * x.dtype.itemsize
                  + block_n * 4 * (3 * c_in + 2 * c_out))
    resident_bytes = 2 * (c_in * c_out * w_t.dtype.itemsize
                          + 4 * (2 * c_in + c_out))
    needed = tile_bytes + resident_bytes
    vmem_limit = int(min(max(2 * needed, 32 * 1024 * 1024),
                         int(0.9 * _vmem_capacity_bytes())))

    return pl.pallas_call(
        dense_block_kernel,
        out_shape=jax.ShapeDtypeStruct((n, c_out + c_in), x.dtype),
        grid=grid,
        in_specs=[
            pl.BlockSpec((block_n, c_in), lambda i: (i, 0)),   # X: tiled over N
            pl.BlockSpec((1, c_in), lambda i: (0, 0)),         # scale (resident)
            pl.BlockSpec((1, c_in), lambda i: (0, 0)),         # shift (resident)
            pl.BlockSpec((c_in, c_out), lambda i: (0, 0)),     # W^T   (resident)
            pl.BlockSpec((1, c_out), lambda i: (0, 0)),        # bias  (resident)
        ],
        out_specs=pl.BlockSpec((block_n, c_out + c_in), lambda i: (i, 0)),
        compiler_params=pltpu.CompilerParams(
            dimension_semantics=("parallel",),
            vmem_limit_bytes=vmem_limit,
        ),
    )(x, scale, shift, w_t, b2)


def dense_block_reference(x, gamma, beta, w, b):
    """Pure-JAX reference (PyTorch layout W: (C_out, C_in))."""
    mean = jnp.mean(x, axis=0, keepdims=True)
    var = jnp.mean((x - mean) ** 2, axis=0, keepdims=True)
    h = (x - mean) / jnp.sqrt(var + BN_EPS) * gamma + beta
    h = jax.nn.sigmoid(h) * h
    y = h @ w.T + b
    return jnp.concatenate([y, x], axis=1)


if __name__ == "__main__":
    # Small shapes consistent with the module: X is (batch, in_channels).
    batch = 8
    in_channels = 32
    out_channels = 16

    key = jax.random.PRNGKey(0)
    kx, kw = jax.random.split(key, 2)

    x = jax.random.normal(kx, (batch, in_channels), dtype=jnp.float32)

    # DenseBlock.reset_parameters():
    #   bn1.weight = 1, bn1.bias = 0
    #   fc1.weight ~ kaiming_normal(fan_out, relu) -> N(0, 2/out_channels)
    #   fc1.bias   = 0
    gamma = jnp.ones((in_channels,), dtype=jnp.float32)
    beta = jnp.zeros((in_channels,), dtype=jnp.float32)
    w = (jax.random.normal(kw, (out_channels, in_channels), dtype=jnp.float32)
         * jnp.sqrt(2.0 / out_channels))
    b = jnp.zeros((out_channels,), dtype=jnp.float32)

    # Pre-transpose the Linear weight ONCE at init time (out of the hot path).
    w_t = jnp.transpose(w)  # (C_in, C_out)

    y = dense_block_forward(x, gamma, beta, w_t, b)
    y = jax.block_until_ready(y)

    y_ref = dense_block_reference(x, gamma, beta, w, b)
    assert y.shape == (batch, out_channels + in_channels)
    assert jnp.allclose(y, y_ref, atol=1e-5, rtol=1e-5), "mismatch vs reference"

    print("KERNEL_OK")
</pallas_src>

<mosaic_0001>
module attributes {stable_mosaic.version = 11 : i64} {
  func.func @dense_block_kernel(%arg0: i32, %arg1: memref<8x32xf32, #tpu.memory_space<vmem>>, %arg2: memref<1x32xf32, #tpu.memory_space<vmem>>, %arg3: memref<1x32xf32, #tpu.memory_space<vmem>>, %arg4: memref<32x16xf32, #tpu.memory_space<vmem>>, %arg5: memref<1x16xf32, #tpu.memory_space<vmem>>, %arg6: memref<8x48xf32, #tpu.memory_space<vmem>>) attributes {dimension_semantics = [#tpu.dimension_semantics<parallel>], iteration_bounds = array<i64: 1>, scalar_prefetch = 0 : i64, scratch_operands = 0 : i64, tpu.core_type = #tpu.core_type<tc>, window_params = [{transform_indices = @transform_0, window_bounds = array<i64: 8, 32>}, {pipeline_mode = #tpu.pipeline_mode<synchronous>, transform_indices = @transform_1, window_bounds = array<i64: 1, 32>}, {pipeline_mode = #tpu.pipeline_mode<synchronous>, transform_indices = @transform_2, window_bounds = array<i64: 1, 32>}, {pipeline_mode = #tpu.pipeline_mode<synchronous>, transform_indices = @transform_3, window_bounds = array<i64: 32, 16>}, {pipeline_mode = #tpu.pipeline_mode<synchronous>, transform_indices = @transform_4, window_bounds = array<i64: 1, 16>}, {transform_indices = @transform_5, window_bounds = array<i64: 8, 48>}]} {
    %c0 = arith.constant 0 : index
    %c0_0 = arith.constant 0 : index
    %0 = vector.load %arg1[%c0, %c0_0] : memref<8x32xf32, #tpu.memory_space<vmem>>, vector<8x32xf32>
    %c0_1 = arith.constant 0 : index
    %c0_2 = arith.constant 0 : index
    %1 = vector.load %arg2[%c0_1, %c0_2] : memref<1x32xf32, #tpu.memory_space<vmem>>, vector<1x32xf32>
    %2 = vector.broadcast %1 : vector<1x32xf32> to vector<8x32xf32>
    %3 = arith.mulf %0, %2 : vector<8x32xf32>
    %c0_3 = arith.constant 0 : index
    %c0_4 = arith.constant 0 : index
    %4 = vector.load %arg3[%c0_3, %c0_4] : memref<1x32xf32, #tpu.memory_space<vmem>>, vector<1x32xf32>
    %5 = vector.broadcast %4 : vector<1x32xf32> to vector<8x32xf32>
    %6 = arith.addf %3, %5 : vector<8x32xf32>
    %7 = arith.negf %6 : vector<8x32xf32>
    %8 = math.exp %7 : vector<8x32xf32>
    %cst = arith.constant 1.000000e+00 : f32
    %9 = vector.broadcast %cst : f32 to vector<8x32xf32>
    %10 = arith.addf %9, %8 : vector<8x32xf32>
    %11 = arith.divf %9, %10 : vector<8x32xf32>
    %12 = arith.mulf %11, %6 : vector<8x32xf32>
    %c0_5 = arith.constant 0 : index
    %c0_6 = arith.constant 0 : index
    %13 = vector.load %arg4[%c0_5, %c0_6] : memref<32x16xf32, #tpu.memory_space<vmem>>, vector<32x16xf32>
    %cst_7 = arith.constant dense<0.000000e+00> : vector<8x16xf32>
    %14 = tpu.matmul %12, %13, %cst_7 {dimension_numbers = #tpu.dot_dimension_numbers<[1], [0], [0], [1], [0, 0, 1, 1], [], []>} : vector<8x32xf32>, vector<32x16xf32>, vector<8x16xf32> -> vector<8x16xf32>
    %c0_8 = arith.constant 0 : index
    %c0_9 = arith.constant 0 : index
    %15 = vector.load %arg5[%c0_8, %c0_9] : memref<1x16xf32, #tpu.memory_space<vmem>>, vector<1x16xf32>
    %16 = vector.broadcast %15 : vector<1x16xf32> to vector<8x16xf32>
    %17 = arith.addf %14, %16 : vector<8x16xf32>
    %c0_10 = arith.constant 0 : index
    %c0_11 = arith.constant 0 : index
    %18 = vector.load %arg6[%c0_10, %c0_11] : memref<8x48xf32, #tpu.memory_space<vmem>>, vector<8x16xf32>
    tpu.vector_store %arg6[%c0_10, %c0_11], %17 {strides = array<i32>} : memref<8x48xf32, #tpu.memory_space<vmem>>, vector<8x16xf32>,
    %c0_12 = arith.constant 0 : index
    %c16 = arith.constant 16 : index
    %19 = vector.load %arg6[%c0_12, %c16] : memref<8x48xf32, #tpu.memory_space<vmem>>, vector<8x32xf32>
    tpu.vector_store %arg6[%c0_12, %c16], %0 {strides = array<i32>} : memref<8x48xf32, #tpu.memory_space<vmem>>, vector<8x32xf32>,
    return
  }
  func.func @transform_0(%arg0: i32) -> (i32, i32) {
    %c0_i32 = arith.constant 0 : i32
    %c0_i32_0 = arith.constant 0 : i32
    return %arg0, %c0_i32 : i32, i32
  }
  func.func @transform_1(%arg0: i32) -> (i32, i32) {
    %c0_i32 = arith.constant 0 : i32
    %c0_i32_0 = arith.constant 0 : i32
    %c0_i32_1 = arith.constant 0 : i32
    return %c0_i32, %c0_i32_0 : i32, i32
  }
  func.func @transform_2(%arg0: i32) -> (i32, i32) {
    %c0_i32 = arith.constant 0 : i32
    %c0_i32_0 = arith.constant 0 : i32
    %c0_i32_1 = arith.constant 0 : i32
    return %c0_i32, %c0_i32_0 : i32, i32
  }
  func.func @transform_3(%arg0: i32) -> (i32, i32) {
    %c0_i32 = arith.constant 0 : i32
    %c0_i32_0 = arith.constant 0 : i32
    %c0_i32_1 = arith.constant 0 : i32
    return %c0_i32, %c0_i32_0 : i32, i32
  }
  func.func @transform_4(%arg0: i32) -> (i32, i32) {
    %c0_i32 = arith.constant 0 : i32
    %c0_i32_0 = arith.constant 0 : i32
    %c0_i32_1 = arith.constant 0 : i32
    return %c0_i32, %c0_i32_0 : i32, i32
  }
  func.func @transform_5(%arg0: i32) -> (i32, i32) {
    %c0_i32 = arith.constant 0 : i32
    %c0_i32_0 = arith.constant 0 : i32
    return %arg0, %c0_i32 : i32, i32
  }
}

</mosaic_0001>

<bundles_post_ra>
// kernel: tpu_custom_call.1
= control target key start
LH: loop header
LB: loop body
LE: loop exit
PB: predicated region body
PF: predicated region fallthrough
CT: control target
= control target key end

     0   :  { %v203_v1 = vmov 0.0   ;;  %vm204_vm0 = vmmov 0   ;;  %s205_s28 = smov 16   ;;  %s264_s0 = inlined_call_operand.vmem [shape: f32[8,32], index: 0, kind: input, shape index: {}]   ;;  %s265_s1 = inlined_call_operand.vmem [shape: f32[1,32], index: 1, kind: input, shape index: {}]   ;;  %s266_s2 = inlined_call_operand.vmem [shape: f32[1,32], index: 2, kind: input, shape index: {}]   ;;  %s267_s3 = inlined_call_operand.vmem [shape: f32[32,16], index: 3, kind: input, shape index: {}]   ;;  %s268_s4 = inlined_call_operand.vmem [shape: f32[1,16], index: 4, kind: input, shape index: {}]   ;;  %s269_s5 = inlined_call_operand.hbm [shape: f32[8,48], index: 5, kind: output, shape index: {}]  }
   0x1   :  { %v48_v0 = vld [vmem:[%s267_s3 + $0x18] sm:$0xff]  ;;  %162 = vmatprep.subr.mxu0 %v203_v1  ;;  %v47_v2 = vld [vmem:[%s267_s3 + $0x10] sm:$0xff]  ;;  %170 = vmatprep.mubr.msk.f32.mxu0 %vm204_vm0, %v203_v1  ;;  %v21_v3 = vld [vmem:[%s264_s0] sm:$0xff] }
   0x2   :  { %v152_v4 = vld [vmem:[%s265_s1] ss:$0 sm:$0xff]  ;;  %163 = vmatpush3.msra.mxu0 %v48_v0  ;;  %133 = vrot.lane.b32.xlu0 %v21_v3, %s205_s28 }
   0x3   :  { %v29_v5 = vmul.f32 %v152_v4, %v21_v3  ;;  %v153_v6 = vld [vmem:[%s266_s2] ss:$0 sm:$0xff] }
   0x4   :  { %10 = vsyncpa [#allocation3], 0  ;;  %164 = vmatprep.subr.mxu0 %v203_v1  ;;  %v46_v7 = vld [vmem:[%s267_s3 + $0x8] sm:$0xff]  ;;  %v45_v9 = vld [vmem:[%s267_s3] sm:$0xff]  ;;  %vm56_vm1 = vcmask 261120   ;;  %s206_s7 = smov [#allocation2]  }
   0x5   :  { %165 = vmatpush3.msra.mxu0 %v47_v2  ;;  %v37_v8 = vadd.f32 %v153_v6, %v29_v5  ;;  %v155_v15 = vld [vmem:[%s268_s4] ss:$0 sm:$0xff]  ;;  %s144_s8 = sshll.u32 %s206_s7, 4  ;;  %vm130_vm2 = vcmask 130048   ;;  %vm136_vm3 = vcmask 392320   ;;  %s145_s8 = int_to_ptr.vmem [resolvable:$true] %s144_s8 }
   0x6   :  { %166 = vmatprep.subr.mxu0 %v203_v1  ;;  %s181_s3 = scalar_lea.vmem %s145_s8, 128  ;;  %p186_p1 = scmp.lt.s32.totalorder %s145_s8, %s145_s8 }
   0x7   :  { %167 = vmatpush3.msra.mxu0 %v46_v7  ;;  %v154_v10 = vmul.f32 -1.442695, %v37_v8  ;;  %p182_p0 = scmp.ne.s32.totalorder %s145_s8, %s181_s3  ;;  %p187_p2 = scmp.lt.s32.totalorder %s181_s3, %s181_s3 }
   0x8   :  { %168 = vmatprep.subr.mxu0 %v203_v1 }
   0x9   :  { %169 = vmatpush3.msra.mxu0 %v45_v9  ;;  %177 = vpow2.f32 %v154_v10  ;;  %p188_p3 = por %p187_p2, %p186_p1 }
   0xb   :  { %p189_p4 = pnand %p188_p3, %p182_p0 }
  0x16   :  { %v178_v11 = vpop.eup %177 }
  0x17   :  { %v41_v12 = vadd.f32 1.0, %v178_v11 }
  0x19   :  { %179 = vrcp.f32 %v41_v12 }
  0x26   :  { %v180_v13 = vpop.eup %179 }
  0x27   :  { %v44_v14 = vmul.f32 %v180_v13, %v37_v8 }
  0x29   :  { %171 = vmatmul.mubr.msk.f32.vlgmr.msra.gmra.mxu0 %vm56_vm1, %v44_v14 }
  0x74   :  { %v134_v18 = vpop.permute.xlu0 %133 }
  0xe9   :  { %v126_v16 = vpop.f32.mrf.mxu0 }
  0xea   :  { %v127_v17 = vadd.f32 %v155_v15, %v126_v16 }
  0xeb   :  { %v172_v19 = vpop.f32.mrf.mxu0 }
  0xec   :  { %131 = vst.msk [vmem:[#allocation2] sm:$0xff] %vm130_vm2, %v127_v17 }
  0xed   :  { %137 = vst.msk [vmem:[#allocation2] sm:$0xff] %vm136_vm3, %v134_v18 }
  0xee   :  { %192 = shalt.err (!%p189_p4)
}
  0xef   :  { %147 = dma.vmem_to_hbm [thread:$0]  %s145_s8, 128, %s269_s5, [#allocation3]  }
  0xf0   :  { %201 = dma.done.wait [#allocation3], 128  }
  0xf1   :  { %202 = vsyncadd [#allocation3], 4294967168 }
  0xf2   :  { %151 = vsyncpa [#allocation3], 1 }

</bundles_post_ra>
